<compile_context>
chip_gen: v7x
topology: tpu7x:2x2x1
jax: 0.10.0
libtpu: 0.0.40
codegen_flags: <defaults>
</compile_context>

<pallas_src>
import math
import functools

import jax
import jax.numpy as jnp
from jax import lax
from jax.experimental import pallas as pl
from jax.experimental.pallas import tpu as pltpu


def _round_up(x, m):
    return (x + m - 1) // m * m


def _vmem_capacity_bytes():
    try:
        return int(pltpu.get_tpu_info().vmem_capacity_bytes)
    except Exception:
        return 64 * 1024 * 1024  # conservative fallback (v7x per-TC size)


def _arcface_kernel(x_ref, w_ref, lbl_ref, o_ref, wnT_ref, *maybe_xn,
                    cos_m, sin_m, th, mm, s, easy_margin,
                    tile_c, tile_b, x_resident, mxu_dtype):
    j = pl.program_id(0)          # class-tile index (outer grid axis)
    b = pl.program_id(1)          # batch-tile index (inner grid axis)

    xn_ref = maybe_xn[0] if x_resident else None

    @pl.when(b == 0)
    def _():
        # Normalize this weight tile once per class tile; store it transposed
        # (F, tile_c) in MXU dtype so the inner dot needs no per-step relayout.
        w = w_ref[...].astype(jnp.float32)
        w_ssq = jnp.sum(w * w, axis=1, keepdims=True)
        # F.normalize eps: v / max(||v||, 1e-12) == v * rsqrt(max(||v||^2, 1e-24))
        wn = w * lax.rsqrt(jnp.maximum(w_ssq, 1e-24))
        wnT_ref[...] = wn.T.astype(wnT_ref.dtype)
        if x_resident:
            # Normalize the whole resident activation block.  Gated on b == 0
            # (not j == 0) so it stays correct if the class axis is sharded
            # across TensorCores; the recompute per class tile is negligible.
            x = x_ref[...].astype(jnp.float32)
            x_ssq = jnp.sum(x * x, axis=1, keepdims=True)
            xn_ref[...] = (x * lax.rsqrt(jnp.maximum(x_ssq, 1e-24))).astype(xn_ref.dtype)

    if x_resident:
        row0 = pl.multiple_of(b * tile_b, tile_b)
        xn = xn_ref[pl.ds(row0, tile_b), :]
    else:
        x = x_ref[...].astype(jnp.float32)
        x_ssq = jnp.sum(x * x, axis=1, keepdims=True)
        xn = (x * lax.rsqrt(jnp.maximum(x_ssq, 1e-24))).astype(mxu_dtype)

    # cosine = xn @ wn^T as a canonical (tile_b, F) @ (F, tile_c) contraction.
    cosine = jnp.dot(xn, wnT_ref[...], preferred_element_type=jnp.float32)

    # Trimmed VPU epilogue: upper clip of 1 - c^2 is redundant; fold the *s
    # scale into the branch constants to drop the trailing full-tile multiply.
    sine = jnp.sqrt(jnp.maximum(1.0 - cosine * cosine, 0.0))
    cos_s = cosine * s
    phi_s = cos_s * cos_m - sine * (s * sin_m)
    if easy_margin:
        phi_s = jnp.where(cosine > 0.0, phi_s, cos_s)
    else:
        phi_s = jnp.where(cosine > th, phi_s, cos_s - s * mm)

    tb, tc = o_ref.shape
    col_ids = lax.broadcasted_iota(jnp.int32, (tb, tc), 1)
    lbl_local = lbl_ref[...] - j * tile_c          # (tile_b, 1) offset-adjusted labels
    o_ref[...] = jnp.where(col_ids == lbl_local, phi_s, cos_s).astype(o_ref.dtype)


def _pick_tiles(B, C, F_pad, w_itemsize, mxu_itemsize, tile_b=None, tile_c=None):
    """Per-generation tile sizing: big tiles on 128 MiB-VMEM parts, small on v7x."""
    big_vmem = _vmem_capacity_bytes() >= 100 * 1024 * 1024     # v5e / v6e
    if tile_b is None:
        tile_b = min(256 if big_vmem else 128, _round_up(B, 8))
    B_pad = _round_up(B, tile_b)
    n_b = B_pad // tile_b
    n_wbuf = 3 if n_b == 1 else 2          # deeper weight pipeline in stream mode
    if tile_c is None:
        budget = (28 if big_vmem else 12) * 1024 * 1024
        cap = 4096 if big_vmem else 2048
        per_col = F_pad * (n_wbuf * w_itemsize + mxu_itemsize) + tile_b * 4 * 2
        tile_c = (budget // per_col) // 128 * 128
        tile_c = int(max(128, min(tile_c, cap, _round_up(C, 128))))
    C_pad = _round_up(C, tile_c)
    return int(tile_b), int(tile_c), B_pad, C_pad, big_vmem


def arc_margin_product(x, weight, label, *, s=30.0, m=0.5, easy_margin=False,
                       tile_c=None, tile_b=None, mxu_dtype=None,
                       out_dtype=jnp.float32):
    """ArcFace forward.  x: (B, F), weight: (C, F), label: (B,) int -> (B, C)."""
    B, F = x.shape
    C, F2 = weight.shape
    assert F == F2

    cos_m = math.cos(m)
    sin_m = math.sin(m)
    th = math.cos(math.pi - m)
    mm_ = math.sin(math.pi - m) * m

    if mxu_dtype is None:
        # Native bf16 MXU rate when the caller already uses bf16; exact f32
        # otherwise (keeps 1e-4-level parity with the PyTorch f32 module).
        mxu_dtype = (jnp.bfloat16
                     if (x.dtype == jnp.bfloat16 and weight.dtype == jnp.bfloat16)
                     else jnp.float32)
    mxu_dtype = jnp.dtype(mxu_dtype)

    F_pad = _round_up(F, 128)      # lane / MXU-contraction alignment
    tile_b, tile_c, B_pad, C_pad, big_vmem = _pick_tiles(
        B, C, F_pad, jnp.dtype(weight.dtype).itemsize, mxu_dtype.itemsize,
        tile_b=tile_b, tile_c=tile_c)

    # Zero padding: padded rows/classes/features do not change norms or dots;
    # padded classes are sliced off at the end.
    if (B_pad, F_pad) != (B, F):
        x = jnp.pad(x, ((0, B_pad - B), (0, F_pad - F)))
    if (C_pad, F_pad) != (C, F):
        weight = jnp.pad(weight, ((0, C_pad - C), (0, F_pad - F)))

    label2d = label.astype(jnp.int32).reshape(B, 1)
    if B_pad != B:
        label2d = jnp.pad(label2d, ((0, B_pad - B), (0, 0)), constant_values=-1)

    n_c = C_pad // tile_c
    n_b = B_pad // tile_b

    # Keep the whole activation block resident in VMEM (fetched once, normalized
    # once per class tile) when small; otherwise stream it per batch tile.
    x_resident = B_pad * F_pad * 4 <= 4 * 1024 * 1024
    if x_resident:
        x_spec = pl.BlockSpec((B_pad, F_pad), lambda j, i: (0, 0))
        xn_scratch = [pltpu.VMEM((B_pad, F_pad), mxu_dtype)]
    else:
        x_spec = pl.BlockSpec((tile_b, F_pad), lambda j, i: (i, 0))
        xn_scratch = []

    w_spec_kwargs = {}
    if n_b == 1 and n_c >= 3:
        # Small-batch weight-streaming regime: deepen the weight pipeline so
        # the next class tile's DMA is not exposed behind a short step.
        w_spec_kwargs["pipeline_mode"] = pl.Buffered(3)
    w_spec = pl.BlockSpec((tile_c, F_pad), lambda j, i: (j, 0), **w_spec_kwargs)

    kernel = functools.partial(
        _arcface_kernel,
        cos_m=cos_m, sin_m=sin_m, th=th, mm=mm_, s=s, easy_margin=easy_margin,
        tile_c=tile_c, tile_b=tile_b, x_resident=x_resident, mxu_dtype=mxu_dtype)

    out = pl.pallas_call(
        kernel,
        out_shape=jax.ShapeDtypeStruct((B_pad, C_pad), out_dtype),
        grid_spec=pltpu.PrefetchScalarGridSpec(
            num_scalar_prefetch=0,
            grid=(n_c, n_b),                                    # class tiles outer, batch tiles inner
            in_specs=[
                x_spec,                                         # activations
                w_spec,                                         # weight class tile
                pl.BlockSpec((tile_b, 1), lambda j, i: (i, 0)), # labels
            ],
            out_specs=pl.BlockSpec((tile_b, tile_c), lambda j, i: (i, j)),
            scratch_shapes=[pltpu.VMEM((F_pad, tile_c), mxu_dtype)] + xn_scratch,
        ),
        compiler_params=pltpu.CompilerParams(
            # Batch axis must stay sequential ("arbitrary"): the wn/xn scratch
            # is reused across it.  Class axis "parallel" -> megacore shards
            # the weight stream.
            dimension_semantics=("parallel", "arbitrary"),
            vmem_limit_bytes=(64 if big_vmem else 40) * 1024 * 1024),
        cost_estimate=pl.CostEstimate(
            flops=2 * B_pad * C_pad * F_pad,
            transcendentals=B_pad * C_pad + B_pad * n_c + C_pad,
            bytes_accessed=int(x.size * x.dtype.itemsize
                               + weight.size * weight.dtype.itemsize
                               + B_pad * C_pad * jnp.dtype(out_dtype).itemsize)),
    )(x, weight, label2d)

    return out[:B, :C]


def _reference(x, weight, label, *, s=30.0, m=0.5, easy_margin=False):
    """Pure-JAX (f32) reference of the PyTorch forward; also returns cosine."""
    cos_m, sin_m = math.cos(m), math.sin(m)
    th = math.cos(math.pi - m)
    mm = math.sin(math.pi - m) * m
    x = x.astype(jnp.float32)
    weight = weight.astype(jnp.float32)
    xn = x / jnp.maximum(jnp.linalg.norm(x, axis=1, keepdims=True), 1e-12)
    wn = weight / jnp.maximum(jnp.linalg.norm(weight, axis=1, keepdims=True), 1e-12)
    cosine = xn @ wn.T
    sine = jnp.sqrt(jnp.clip(1.0 - cosine ** 2, 0.0, 1.0))
    phi = cosine * cos_m - sine * sin_m
    if easy_margin:
        phi = jnp.where(cosine > 0.0, phi, cosine)
    else:
        phi = jnp.where(cosine > th, phi, cosine - mm)
    one_hot = jax.nn.one_hot(label, cosine.shape[1], dtype=cosine.dtype)
    return (one_hot * phi + (1.0 - one_hot) * cosine) * s, cosine


def _check(out, ref_out, cosine, *, easy_margin, m, atol, rtol, guard):
    """Elementwise closeness, ignoring entries sitting on the margin-branch
    discontinuity (where an epsilon-level cosine difference flips the select)."""
    thresh = 0.0 if easy_margin else math.cos(math.pi - m)
    safe = jnp.abs(cosine - thresh) > guard
    ok = jnp.abs(out.astype(jnp.float32) - ref_out) <= atol + rtol * jnp.abs(ref_out)
    assert bool(jnp.all(jnp.where(safe, ok, True))), "mismatch vs reference"


if __name__ == "__main__":
    s_scale, margin = 30.0, 0.5

    # Config 1: small shapes exercising C tiling (2 class tiles), B/C/F zero
    # padding, the tile-offset label logic, and both margin branches (f32 MXU).
    in_features, out_features, batch = 32, 200, 6
    key = jax.random.PRNGKey(0)
    k_x, k_w, k_l = jax.random.split(key, 3)
    bound = math.sqrt(6.0 / (in_features + out_features))      # xavier_uniform_
    weight = jax.random.uniform(
        k_w, (out_features, in_features), jnp.float32, minval=-bound, maxval=bound)
    x = jax.random.normal(k_x, (batch, in_features), jnp.float32)
    label = jax.random.randint(k_l, (batch,), 0, out_features, jnp.int32)

    for easy in (False, True):
        out = jax.block_until_ready(
            arc_margin_product(x, weight, label, s=s_scale, m=margin,
                               easy_margin=easy, tile_c=128))
        ref, cosine = _reference(x, weight, label, s=s_scale, m=margin,
                                 easy_margin=easy)
        assert out.shape == (batch, out_features)
        _check(out, ref, cosine, easy_margin=easy, m=margin,
               atol=1e-4, rtol=1e-4, guard=1e-4)

    # Config 2: default (auto) tile selection path, f32 inputs.
    in2, c2_classes, b2 = 64, 512, 8
    k_x2, k_w2, k_l2 = jax.random.split(jax.random.PRNGKey(1), 3)
    bound2 = math.sqrt(6.0 / (in2 + c2_classes))
    w2 = jax.random.uniform(k_w2, (c2_classes, in2), jnp.float32,
                            minval=-bound2, maxval=bound2)
    x2 = jax.random.normal(k_x2, (b2, in2), jnp.float32)
    l2 = jax.random.randint(k_l2, (b2,), 0, c2_classes, jnp.int32)
    o2 = jax.block_until_ready(arc_margin_product(x2, w2, l2, s=s_scale, m=margin))
    r2, cos2 = _reference(x2, w2, l2, s=s_scale, m=margin)
    assert o2.shape == (b2, c2_classes)
    _check(o2, r2, cos2, easy_margin=False, m=margin, atol=1e-4, rtol=1e-4, guard=1e-4)

    # Config 3: bf16 inputs -> native bf16 MXU path, plus the deepened
    # (Buffered(3)) weight stream (n_b == 1, 5 class tiles).  bf16 tolerance.
    in3, c3_classes, b3 = 128, 640, 16
    k_x3, k_w3, k_l3 = jax.random.split(jax.random.PRNGKey(2), 3)
    bound3 = math.sqrt(6.0 / (in3 + c3_classes))
    w3 = jax.random.uniform(k_w3, (c3_classes, in3), jnp.float32,
                            minval=-bound3, maxval=bound3).astype(jnp.bfloat16)
    x3 = jax.random.normal(k_x3, (b3, in3), jnp.float32).astype(jnp.bfloat16)
    l3 = jax.random.randint(k_l3, (b3,), 0, c3_classes, jnp.int32)
    o3 = jax.block_until_ready(
        arc_margin_product(x3, w3, l3, s=s_scale, m=margin, tile_c=128))
    r3, cos3 = _reference(x3, w3, l3, s=s_scale, m=margin)
    assert o3.shape == (b3, c3_classes)
    _check(o3, r3, cos3, easy_margin=False, m=margin, atol=0.5, rtol=0.05, guard=0.02)

    print("KERNEL_OK")
</pallas_src>

<mosaic_0001>
module attributes {stable_mosaic.version = 11 : i64} {
  func.func @_arcface_kernel(%arg0: i32, %arg1: i32, %arg2: memref<8x128xf32, #tpu.memory_space<vmem>>, %arg3: memref<128x128xf32, #tpu.memory_space<vmem>>, %arg4: memref<8x1xi32, #tpu.memory_space<vmem>>, %arg5: memref<8x128xf32, #tpu.memory_space<vmem>>, %arg6: memref<128x128xf32, #tpu.memory_space<vmem>>, %arg7: memref<8x128xf32, #tpu.memory_space<vmem>>) attributes {dimension_semantics = [#tpu.dimension_semantics<parallel>, #tpu.dimension_semantics<arbitrary>], iteration_bounds = array<i64: 2, 1>, scalar_prefetch = 0 : i64, scratch_operands = 2 : i64, tpu.core_type = #tpu.core_type<tc>, window_params = [{pipeline_mode = #tpu.pipeline_mode<synchronous>, transform_indices = @transform_0, window_bounds = array<i64: 8, 128>}, {transform_indices = @transform_1, window_bounds = array<i64: 128, 128>}, {transform_indices = @transform_2, window_bounds = array<i64: 8, 1>}, {transform_indices = @transform_3, window_bounds = array<i64: 8, 128>}]} {
    %c0_i32 = arith.constant 0 : i32
    %0 = arith.cmpi eq, %arg1, %c0_i32 : i32
    %1 = arith.extui %0 : i1 to i32
    %c0_i32_0 = arith.constant 0 : i32
    %2 = arith.cmpi ne, %1, %c0_i32_0 : i32
    scf.if %2 {
      %c0_14 = arith.constant 0 : index
      %c0_15 = arith.constant 0 : index
      %36 = vector.load %arg3[%c0_14, %c0_15] : memref<128x128xf32, #tpu.memory_space<vmem>>, vector<128x128xf32>
      %37 = arith.mulf %36, %36 : vector<128x128xf32>
      %cst_16 = arith.constant dense<0.000000e+00> : vector<128xf32>
      %38 = vector.multi_reduction <add>, %37, %cst_16 [1] : vector<128x128xf32> to vector<128xf32>
      %39 = vector.shape_cast %38 : vector<128xf32> to vector<128x1xf32>
      %cst_17 = arith.constant 1.000000e-24 : f32
      %40 = vector.broadcast %cst_17 : f32 to vector<128x1xf32>
      %41 = arith.maximumf %39, %40 : vector<128x1xf32>
      %42 = math.rsqrt %41 : vector<128x1xf32>
      %43 = vector.broadcast %42 : vector<128x1xf32> to vector<128x128xf32>
      %44 = arith.mulf %36, %43 : vector<128x128xf32>
      %45 = tpu.transpose %44, [1, 0] : vector<128x128xf32> -> vector<128x128xf32>
      %c0_18 = arith.constant 0 : index
      %c0_19 = arith.constant 0 : index
      %46 = vector.load %arg6[%c0_18, %c0_19] : memref<128x128xf32, #tpu.memory_space<vmem>>, vector<128x128xf32>
      tpu.vector_store %arg6[%c0_18, %c0_19], %45 {strides = array<i32>} : memref<128x128xf32, #tpu.memory_space<vmem>>, vector<128x128xf32>,
      %c0_20 = arith.constant 0 : index
      %c0_21 = arith.constant 0 : index
      %47 = vector.load %arg2[%c0_20, %c0_21] : memref<8x128xf32, #tpu.memory_space<vmem>>, vector<8x128xf32>
      %48 = arith.mulf %47, %47 : vector<8x128xf32>
      %cst_22 = arith.constant dense<0.000000e+00> : vector<8xf32>
      %49 = vector.multi_reduction <add>, %48, %cst_22 [1] : vector<8x128xf32> to vector<8xf32>
      %50 = vector.shape_cast %49 : vector<8xf32> to vector<8x1xf32>
      %cst_23 = arith.constant 1.000000e-24 : f32
      %51 = vector.broadcast %cst_23 : f32 to vector<8x1xf32>
      %52 = arith.maximumf %50, %51 : vector<8x1xf32>
      %53 = math.rsqrt %52 : vector<8x1xf32>
      %54 = vector.broadcast %53 : vector<8x1xf32> to vector<8x128xf32>
      %55 = arith.mulf %47, %54 : vector<8x128xf32>
      %c0_24 = arith.constant 0 : index
      %c0_25 = arith.constant 0 : index
      %56 = vector.load %arg7[%c0_24, %c0_25] : memref<8x128xf32, #tpu.memory_space<vmem>>, vector<8x128xf32>
      tpu.vector_store %arg7[%c0_24, %c0_25], %55 {strides = array<i32>} : memref<8x128xf32, #tpu.memory_space<vmem>>, vector<8x128xf32>,
    } else {
    }
    %c8_i32 = arith.constant 8 : i32
    %3 = arith.muli %arg1, %c8_i32 : i32
    %4 = tpu.assume_multiple %3, 8 : i32
    %5 = arith.index_cast %4 : i32 to index
    %c0 = arith.constant 0 : index
    %6 = vector.load %arg7[%5, %c0] : memref<8x128xf32, #tpu.memory_space<vmem>>, vector<8x128xf32>
    %c0_1 = arith.constant 0 : index
    %c0_2 = arith.constant 0 : index
    %7 = vector.load %arg6[%c0_1, %c0_2] : memref<128x128xf32, #tpu.memory_space<vmem>>, vector<128x128xf32>
    %cst = arith.constant dense<0.000000e+00> : vector<8x128xf32>
    %8 = tpu.matmul %6, %7, %cst {dimension_numbers = #tpu.dot_dimension_numbers<[1], [0], [0], [1], [0, 0, 1, 1], [], []>} : vector<8x128xf32>, vector<128x128xf32>, vector<8x128xf32> -> vector<8x128xf32>
    %9 = arith.mulf %8, %8 : vector<8x128xf32>
    %cst_3 = arith.constant 1.000000e+00 : f32
    %10 = vector.broadcast %cst_3 : f32 to vector<8x128xf32>
    %11 = arith.subf %10, %9 : vector<8x128xf32>
    %cst_4 = arith.constant 0.000000e+00 : f32
    %12 = vector.broadcast %cst_4 : f32 to vector<8x128xf32>
    %13 = arith.maximumf %11, %12 : vector<8x128xf32>
    %14 = math.sqrt %13 : vector<8x128xf32>
    %cst_5 = arith.constant 3.000000e+01 : f32
    %15 = vector.broadcast %cst_5 : f32 to vector<8x128xf32>
    %16 = arith.mulf %8, %15 : vector<8x128xf32>
    %cst_6 = arith.constant 0.87758255 : f32
    %17 = vector.broadcast %cst_6 : f32 to vector<8x128xf32>
    %18 = arith.mulf %16, %17 : vector<8x128xf32>
    %cst_7 = arith.constant 14.3827658 : f32
    %19 = vector.broadcast %cst_7 : f32 to vector<8x128xf32>
    %20 = arith.mulf %14, %19 : vector<8x128xf32>
    %21 = arith.subf %18, %20 : vector<8x128xf32>
    %cst_8 = arith.constant -0.87758255 : f32
    %22 = vector.broadcast %cst_8 : f32 to vector<8x128xf32>
    %23 = arith.cmpf ogt, %8, %22 : vector<8x128xf32>
    %cst_9 = arith.constant 7.19138288 : f32
    %24 = vector.broadcast %cst_9 : f32 to vector<8x128xf32>
    %25 = arith.subf %16, %24 : vector<8x128xf32>
    %26 = arith.select %23, %21, %25 : vector<8x128xi1>, vector<8x128xf32>
    %27 = tpu.iota {dimensions = array<i32: 1>} : vector<8x128xi32>
    %c0_10 = arith.constant 0 : index
    %c0_11 = arith.constant 0 : index
    %28 = vector.load %arg4[%c0_10, %c0_11] : memref<8x1xi32, #tpu.memory_space<vmem>>, vector<8x1xi32>
    %c128_i32 = arith.constant 128 : i32
    %29 = arith.muli %arg0, %c128_i32 : i32
    %30 = vector.broadcast %29 : i32 to vector<8x1xi32>
    %31 = arith.subi %28, %30 : vector<8x1xi32>
    %32 = vector.broadcast %31 : vector<8x1xi32> to vector<8x128xi32>
    %33 = arith.cmpi eq, %27, %32 : vector<8x128xi32>
    %34 = arith.select %33, %26, %16 : vector<8x128xi1>, vector<8x128xf32>
    %c0_12 = arith.constant 0 : index
    %c0_13 = arith.constant 0 : index
    %35 = vector.load %arg5[%c0_12, %c0_13] : memref<8x128xf32, #tpu.memory_space<vmem>>, vector<8x128xf32>
    tpu.vector_store %arg5[%c0_12, %c0_13], %34 {strides = array<i32>} : memref<8x128xf32, #tpu.memory_space<vmem>>, vector<8x128xf32>,
    return
  }
  func.func @transform_0(%arg0: i32, %arg1: i32) -> (i32, i32) {
    %c0_i32 = arith.constant 0 : i32
    %c0_i32_0 = arith.constant 0 : i32
    %c0_i32_1 = arith.constant 0 : i32
    return %c0_i32, %c0_i32_0 : i32, i32
  }
  func.func @transform_1(%arg0: i32, %arg1: i32) -> (i32, i32) {
    %c0_i32 = arith.constant 0 : i32
    %c0_i32_0 = arith.constant 0 : i32
    return %arg0, %c0_i32 : i32, i32
  }
  func.func @transform_2(%arg0: i32, %arg1: i32) -> (i32, i32) {
    %c0_i32 = arith.constant 0 : i32
    %c0_i32_0 = arith.constant 0 : i32
    return %arg1, %c0_i32 : i32, i32
  }
  func.func @transform_3(%arg0: i32, %arg1: i32) -> (i32, i32) {
    %c0_i32 = arith.constant 0 : i32
    return %arg1, %arg0 : i32, i32
  }
}

</mosaic_0001>

<bundles_post_ra>
// kernel: tpu_custom_call.1
= control target key start
LH: loop header
LB: loop body
LE: loop exit
PB: predicated region body
PF: predicated region fallthrough
CT: control target
= control target key end

     0   :  { %8 = vsyncpa [#allocation5], 0  ;;  %s1260_s0 = inlined_call_operand.vmem [shape: f32[8,128], index: 0, kind: input, shape index: {}]   ;;  %s1261_s1 = inlined_call_operand.hbm [shape: f32[256,128], index: 1, kind: input, shape index: {}]   ;;  %s1262_s2 = inlined_call_operand.vmem [shape: s32[8,1], index: 2, kind: input, shape index: {}]   ;;  %s1263_s3 = inlined_call_operand.hbm [shape: f32[8,256], index: 3, kind: output, shape index: {}]  }
   0x1   :  { %10 = vsyncpa [#allocation5 + $0x1], 0 }
   0x2   :  { %11 = vsyncpa [#allocation6], 0 }
   0x3   :  { %13 = vsyncpa [#allocation6 + $0x1], 0  ;;  %s965_s12 = smov 0   ;;  %s967_s13 = smov 0  }
   0x4   :  { %s969_s14 = smov 0   ;;  %s971_s15 = smov 0  }
   0x5   :  { %s973_s16 = smov 0   ;;  %s975_s17 = smov 0  }
   0x6 LB: > { %s624_s18 = sadd.s32 4294967295, %s935_s17   ;;  %s625_s19 = sadd.s32 4294967294, %s935_s17   ;;  %s935_s17 = sphi %s975_s17, %s19_s17   ;;  %s931_s16 = sphi %s973_s16, %s1278_s16   ;;  %s927_s15 = sphi %s971_s15, %s1277_s15   ;;  %s923_s14 = sphi %s969_s14, %s1276_s14   ;;  %s919_s13 = sphi %s967_s13, %s1275_s13   ;;  %s915_s12 = sphi %s965_s12, %s1274_s12  }
   0x7   : > { %s31_s20 = sadd.s32 1, %s931_s16  ;;  %s59_s21 = sadd.s32 1, %s923_s14 }
   0x8   : > { %p33_p0 = scmp.ge.s32.totalorder %s31_s20, 2  ;;  %p66_p1 = scmp.ne.s32.totalorder %s923_s14, %s919_s13 }
   0x9   : > { %p67_p2 = scmp.eq.s32.totalorder %s935_s17, 0  ;;  %p72_p3 = scmp.ne.s32.totalorder %s919_s13, %s915_s12 }
   0xa   : > { %s1280_s20 = smov (%p33_p0, %s31_s20), 0  ;;  %p73_p5 = scmp.eq.s32.totalorder %s624_s18, 0 }
   0xb   : > { %p1006_p4 = por %p67_p2, %p66_p1  ;;  %s56_s23 = ssub.s32 %s931_s16, %s1280_s20 }
   0xc   : > { %p124_p6 = scmp.eq.s32.totalorder %s624_s18, 1  ;;  %p57_p7 = scmp.eq.s32.totalorder %s56_s23, 0 }
   0xd   : > { %p1012_p8 = por %p73_p5, %p72_p3  ;;  %p130_p10 = scmp.eq.s32.totalorder %s625_s19, 1 }
   0xe   : > { %p1016_p9 = por %p124_p6, %p66_p1  ;;  %p730_p13 = scmp.lt.s32.totalorder %s935_s17, 2 }
   0xf   : > { %s1021_s26 = scalar_select %p57_p7, %s923_s14, %s59_s21  }
  0x10   : > { %s1267_s25 = scalar_select %p1016_p9, 1, 0 }
  0x11   : > { %p1023_p11 = por %p130_p10, %p72_p3  ;;  %s160_s28 = sand.u32 1, %s923_s14  }
  0x12   : > { %s629_s29 = sshll.u32 %s160_s28, 7  ;;  %s641_s30 = sshll.u32 %s931_s16, 11 }
  0x13   : > { %s1268_s27 = scalar_select %p1023_p11, 1, 0 }
  0x14   : > { %s1034_s6 = scalar_lea.hbm %s1261_s1, %s641_s30  ;;  %s164_s7 = scalar_lea.vmem [#allocation4], %s629_s29 }
  0x15   : > { %s171_s8 = sshll.u32 %s164_s7, 4  ;;  %p1040_p0 = pnand %p730_p13, %p1006_p4  ;;  %s1036_s8 = int_to_ptr.vmem [resolvable:$true] %s171_s8 }
  0x16   : > { %s1045_s10 = scalar_lea.sflag [#allocation5], %s160_s28  ;;  %s823_s11 = scalar_lea.hbm %s1034_s6, 2048 }
  0x17   : > { %p824_p2 = scmp.ne.s32.totalorder %s1034_s6, %s823_s11  ;;  %p825_p3 = pneg %p1040_p0 }
  0x18   : > { %s828_s21 = scalar_lea.hbm %s1261_s1, 4096  ;;  %p829_p4 = scmp.lt.u32.totalorder %s1034_s6, %s1261_s1 }
  0x19   : > { %p826_p5 = pnand %p825_p3, %p824_p2  ;;  %p830_p7 = scmp.lt.u32.totalorder %s828_s21, %s823_s11 }
  0x1a   : > { %p832_p13 = scmp.lt.u32.totalorder %s823_s11, %s1034_s6 }
  0x1b   : > { %p827_p6 = pneg %p826_p5  ;;  %p831_p10 = por %p830_p7, %p829_p4 }
  0x1d   : > { %p833_p12 = por %p832_p13, %p831_p10 }
  0x1f   : > { %p834_p1 = pnand %p833_p12, %p827_p6 }
  0x21   : > { %837 = shalt.err (!%p834_p1)
}
  0x22   : > { %s838_s28 = scalar_lea.vmem %s1036_s8, 2048  ;;  %s937_s29 = smov [#allocation4]  }
  0x23   : > { %p839_p2 = scmp.ne.s32.totalorder %s1036_s8, %s838_s28  ;;  %s843_s30 = sshll.u32 %s937_s29, 4  ;;  %s844_s30 = int_to_ptr.vmem [resolvable:$false] %s843_s30 }
  0x24   : > { %s845_s4 = scalar_lea.vmem %s844_s30, 4096  ;;  %p846_p9 = scmp.lt.s32.totalorder %s1036_s8, %s844_s30 }
  0x25   : > { %p841_p5 = pnand %p839_p2, %p825_p3  ;;  %p847_p4 = scmp.lt.s32.totalorder %s845_s4, %s838_s28 }
  0x27   : > { %p842_p11 = pneg %p841_p5  ;;  %p848_p7 = por %p847_p4, %p846_p9 }
  0x29   : > { %p849_p10 = pnand %p848_p7, %p842_p11 }
  0x2b   : > { %852 = shalt.err (!%p849_p10)
}
  0x2c   : > { %s938_s5 = smov 128   ;;  %s939_s7 = smov 8  }
  0x2d   : > { %725 = dma.hbm_to_vmem [thread:$0]  (!%p1040_p0), %s1034_s6, 2048, %s1036_s8, %s1045_s10, %s938_s5, %s938_s5, %s939_s7  }
  0x2e   : > { %p179_p12 = scmp.lt.s32.totalorder %s935_s17, 3  ;;  %p1270_p1 = scmp.ge.s32.totalorder %s935_s17, 1 }
  0x30   : > { %p180_p3 = pnand %p1270_p1, %p179_p12 }
  0x31   : > { %s1077_s11 = sand.u32 (!%p180_p3), 1, %s919_s13  }
  0x32   : > { %183 = sbr.rel (%p180_p3) target bundleno = 665 (0x299), region = 32  ;;  %s633_s18 = sshll.u32 (!%p180_p3), %s1077_s11, 7 }
  0x33   : > { %s186_s19 = scalar_lea.sflag (!%p180_p3), [#allocation5], %s1077_s11  ;;  %s1081_s21 = scalar_lea.vmem (!%p180_p3), [#allocation4], %s633_s18 }
  0x39   : > { %906 = dma.done.wait (%p1012_p8), %s186_s19, 2048  }
  0x3a   : > { %908 = vsyncadd (%p1012_p8), %s186_s19, 4294965248  ;;  %v1088_v0 = vld [vmem:[%s1081_s21] sm:$0xff]  ;;  %v1091_v1 = vld [vmem:[%s1081_s21 + $0x8] sm:$0xff]  ;;  %v940_v56 = vmov 0.0|0.0   ;;  %vm941_vm0 = vmmov 0   ;;  %s636_s10 = sshll.u32 %s927_s15, 7 }
  0x3b   : > { %v1094_v2 = vld [vmem:[%s1081_s21 + $0x10] sm:$0xff]  ;;  %v241_v3 = vmul.f32 %v1088_v0, %v1088_v0  ;;  %v1101_v5 = vld [vmem:[%s1081_s21 + $0x18] sm:$0xff]  ;;  %v242_v6 = vmul.f32 %v1091_v1, %v1091_v1  ;;  %v1108_v8 = vld [vmem:[%s1081_s21 + $0x20] sm:$0xff]  ;;  %694 = vmatprep.subr.bf16.mxu0 %v940_v56  ;;  %s634_s22 = sshll.u32 %s1077_s11, 3  ;;  %s1211_s4 = scalar_lea.hbm %s1263_s3, %s636_s10 }
  0x3c   : > { %v243_v4 = vmul.f32 %v1094_v2, %v1094_v2  ;;  %v244_v7 = vmul.f32 %v1101_v5, %v1101_v5  ;;  %v1111_v9 = vld [vmem:[%s1081_s21 + $0x28] sm:$0xff]  ;;  %v245_v10 = vmul.f32 %v1108_v8, %v1108_v8  ;;  %v1118_v12 = vld [vmem:[%s1081_s21 + $0x30] sm:$0xff]  ;;  %v1121_v13 = vld [vmem:[%s1081_s21 + $0x38] sm:$0xff]  ;;  %s215_s23 = scalar_lea.vmem [#allocation7], %s634_s22  ;;  %s512_s5 = scalar_lea.sflag [#allocation6], %s1077_s11 }
  0x3d   : > { %257 = vadd.xlane.f32.xlu0 %v241_v3  ;;  %v246_v11 = vmul.f32 %v1111_v9, %v1111_v9  ;;  %v247_v14 = vmul.f32 %v1118_v12, %v1118_v12  ;;  %v248_v15 = vmul.f32 %v1121_v13, %v1121_v13  ;;  %v1128_v16 = vld [vmem:[%s1081_s21 + $0x40] sm:$0xff]  ;;  %v1131_v17 = vld [vmem:[%s1081_s21 + $0x48] sm:$0xff]  ;;  %v1138_v20 = vld [vmem:[%s1081_s21 + $0x50] sm:$0xff]  ;;  %s527_s28 = sshll.u32 %s215_s23, 4  ;;  %p1271_p9 = scmp.ne.s32.totalorder %s1267_s25, 0  ;;  %s1213_s28 = int_to_ptr.vmem [resolvable:$true] %s527_s28 }
  0x3e   : > { %261 = vadd.xlane.f32.xlu1 %v243_v4  ;;  %v249_v18 = vmul.f32 %v1128_v16, %v1128_v16  ;;  %v250_v19 = vmul.f32 %v1131_v17, %v1131_v17  ;;  %v1141_v21 = vld [vmem:[%s1081_s21 + $0x58] sm:$0xff]  ;;  %v251_v22 = vmul.f32 %v1138_v20, %v1138_v20  ;;  %v1148_v24 = vld [vmem:[%s1081_s21 + $0x60] sm:$0xff]  ;;  %v1151_v25 = vld [vmem:[%s1081_s21 + $0x68] sm:$0xff]  ;;  %s853_s7 = scalar_lea.vmem %s1213_s28, 128  ;;  %s944_s18 = smov [#allocation7]  }
  0x3f   : > { %v252_v23 = vmul.f32 %v1141_v21, %v1141_v21  ;;  %v253_v26 = vmul.f32 %v1148_v24, %v1148_v24  ;;  %v254_v27 = vmul.f32 %v1151_v25, %v1151_v25  ;;  %v1158_v28 = vld [vmem:[%s1081_s21 + $0x70] sm:$0xff]  ;;  %v1161_v29 = vld [vmem:[%s1081_s21 + $0x78] sm:$0xff]  ;;  %v1170_v32 = vld [vmem:[%s1260_s0] sm:$0xff]  ;;  %p854_p8 = scmp.ne.s32.totalorder %s1213_s28, %s853_s7  ;;  %s857_s15 = sshll.u32 %s944_s18, 4  ;;  %s858_s15 = int_to_ptr.vmem [resolvable:$false] %s857_s15 }
  0x40   : > { %v255_v30 = vmul.f32 %v1158_v28, %v1158_v28  ;;  %v256_v31 = vmul.f32 %v1161_v29, %v1161_v29  ;;  %v386_v33 = vmul.f32 %v1170_v32, %v1170_v32  ;;  %s859_s19 = scalar_lea.vmem %s858_s15, 256  ;;  %p860_p6 = scmp.lt.s32.totalorder %s1213_s28, %s858_s15 }
  0x41   : > { %259 = vadd.xlane.f32.xlu0 %v242_v6  ;;  %p855_p11 = pnand %p854_p8, %p1271_p9  ;;  %p861_p13 = scmp.lt.s32.totalorder %s859_s19, %s853_s7 }
  0x42   : > { %263 = vadd.xlane.f32.xlu1 %v244_v7 }
  0x43   : > { %p856_p0 = pneg %p855_p11  ;;  %p862_p2 = por %p861_p13, %p860_p6 }
  0x45   : > { %265 = vadd.xlane.f32.xlu0 %v245_v10  ;;  %p863_p5 = pnand %p862_p2, %p856_p0 }
  0x46   : > { %267 = vadd.xlane.f32.xlu1 %v246_v11 }
  0x49   : > { %269 = vadd.xlane.f32.xlu0 %v247_v14 }
  0x4a   : > { %271 = vadd.xlane.f32.xlu1 %v248_v15 }
  0x4d   : > { %273 = vadd.xlane.f32.xlu0 %v249_v18 }
  0x4e   : > { %275 = vadd.xlane.f32.xlu1 %v250_v19 }
  0x51   : > { %277 = vadd.xlane.f32.xlu0 %v251_v22 }
  0x52   : > { %279 = vadd.xlane.f32.xlu1 %v252_v23 }
  0x55   : > { %281 = vadd.xlane.f32.xlu0 %v253_v26 }
  0x56   : > { %283 = vadd.xlane.f32.xlu1 %v254_v27 }
  0x59   : > { %285 = vadd.xlane.f32.xlu0 %v255_v30 }
  0x5a   : > { %287 = vadd.xlane.f32.xlu1 %v256_v31 }
  0x5d   : > { %387 = vadd.xlane.f32.xlu0 %v386_v33 }
  0xca   : > { %v258_v34 = vpop.xlane.xlu0 %257 }
  0xcb   : > { %v262_v35 = vpop.xlane.xlu1 %261  ;;  %v289_v36 = vmax.f32 %v258_v34, 1e-24 }
  0xcc   : > { %v291_v37 = vmax.f32 %v262_v35, 1e-24 }
  0xcd   : > { %787 = vrsqrt.f32 %v289_v36 }
  0xce   : > { %v260_v38 = vpop.xlane.xlu0 %259  ;;  %789 = vrsqrt.f32 %v291_v37 }
  0xcf   : > { %v264_v39 = vpop.xlane.xlu1 %263  ;;  %v290_v40 = vmax.f32 %v260_v38, 1e-24 }
  0xd0   : > { %v292_v41 = vmax.f32 %v264_v39, 1e-24 }
  0xd1   : > { %791 = vrsqrt.f32 %v290_v40 }
  0xd2   : > { %v266_v42 = vpop.xlane.xlu0 %265  ;;  %793 = vrsqrt.f32 %v292_v41  ;;  %v943_v41 = vmov 0  }
  0xd3   : > { %v293_v43 = vmax.f32 %v266_v42, 1e-24  ;;  %v268_v44 = vpop.xlane.xlu1 %267  ;;  %786 = vset.pattern.permute.xlu0 %v943_v41 }
  0xd4   : > { %v294_v47 = vmax.f32 %v268_v44, 1e-24 }
  0xd5   : > { %795 = vrsqrt.f32 %v293_v43 }
  0xd6   : > { %v270_v49 = vpop.xlane.xlu0 %269  ;;  %797 = vrsqrt.f32 %v294_v47 }
  0xd7   : > { %v788_v45 = vpop.eup %787  ;;  %v295_v52 = vmax.f32 %v270_v49, 1e-24  ;;  %v272_v54 = vpop.xlane.xlu1 %271 }
  0xd8   : > { %v321_v46 = vmul.f32 %v788_v45, %v1088_v0  ;;  %v790_v48 = vpop.eup %789  ;;  %v296_v57 = vmax.f32 %v272_v54, 1e-24 }
  0xd9   : > { %v323_v53 = vmul.f32 %v790_v48, %v1094_v2  ;;  %799 = vrsqrt.f32 %v295_v52 }
  0xda   : > { %337 = vxpose.xlu1.b32.start [1/16] %v321_v46, 128  ;;  %v274_v59 = vpop.xlane.xlu0 %273  ;;  %801 = vrsqrt.f32 %v296_v57 }
  0xdb   : > { %v792_v50 = vpop.eup %791  ;;  %v297_v61 = vmax.f32 %v274_v59, 1e-24  ;;  %v276_v63 = vpop.xlane.xlu1 %275 }
  0xdc   : > { %v322_v51 = vmul.f32 %v792_v50, %v1091_v1  ;;  %v794_v55 = vpop.eup %793  ;;  %v298_v1 = vmax.f32 %v276_v63, 1e-24 }
  0xdd   : > { %v324_v58 = vmul.f32 %v794_v55, %v1101_v5  ;;  %803 = vrsqrt.f32 %v297_v61 }
  0xde   : > { %338 = vxpose.xlu1.b32.cont [2/16] %v322_v51, 128  ;;  %v278_v3 = vpop.xlane.xlu0 %277  ;;  %805 = vrsqrt.f32 %v298_v1 }
  0xdf   : > { %v796_v60 = vpop.eup %795  ;;  %v299_v6 = vmax.f32 %v278_v3, 1e-24  ;;  %v280_v7 = vpop.xlane.xlu1 %279 }
  0xe0   : > { %v325_v62 = vmul.f32 %v796_v60, %v1108_v8  ;;  %v798_v0 = vpop.eup %797  ;;  %v300_v11 = vmax.f32 %v280_v7, 1e-24 }
  0xe1   : > { %v326_v2 = vmul.f32 %v798_v0, %v1111_v9  ;;  %807 = vrsqrt.f32 %v299_v6 }
  0xe2   : > { %339 = vxpose.xlu1.b32.cont [3/16] %v323_v53, 128  ;;  %v282_v14 = vpop.xlane.xlu0 %281  ;;  %809 = vrsqrt.f32 %v300_v11 }
  0xe3   : > { %v800_v4 = vpop.eup %799  ;;  %v301_v18 = vmax.f32 %v282_v14, 1e-24  ;;  %v284_v19 = vpop.xlane.xlu1 %283  ;;  %v499_v14 = vlaneseq }
  0xe4   : > { %v327_v5 = vmul.f32 %v800_v4, %v1118_v12  ;;  %v802_v10 = vpop.eup %801  ;;  %v302_v23 = vmax.f32 %v284_v19, 1e-24 }
  0xe5   : > { %v328_v8 = vmul.f32 %v802_v10, %v1121_v13  ;;  %811 = vrsqrt.f32 %v301_v18 }
  0xe6   : > { %340 = vxpose.xlu1.b32.cont [4/16] %v324_v58, 128  ;;  %v286_v26 = vpop.xlane.xlu0 %285  ;;  %813 = vrsqrt.f32 %v302_v23 }
  0xe7   : > { %v804_v15 = vpop.eup %803  ;;  %v303_v30 = vmax.f32 %v286_v26, 1e-24  ;;  %v288_v31 = vpop.xlane.xlu1 %287 }
  0xe8   : > { %v329_v9 = vmul.f32 %v804_v15, %v1128_v16  ;;  %v806_v22 = vpop.eup %805  ;;  %v304_v34 = vmax.f32 %v288_v31, 1e-24 }
  0xe9   : > { %v330_v12 = vmul.f32 %v806_v22, %v1131_v17  ;;  %815 = vrsqrt.f32 %v303_v30  ;;  %v500_v22 = vand.u32 127, %v499_v14 }
  0xea   : > { %341 = vxpose.xlu1.b32.cont [5/16] %v325_v62, 128  ;;  %817 = vrsqrt.f32 %v304_v34  ;;  %v388_v58 = vpop.xlane.xlu0 %387 }
  0xeb   : > { %v808_v27 = vpop.eup %807  ;;  %v389_v61 = vmax.f32 %v388_v58, 1e-24 }
  0xec   : > { %v331_v13 = vmul.f32 %v808_v27, %v1138_v20  ;;  %v810_v33 = vpop.eup %809 }
  0xed   : > { %v332_v16 = vmul.f32 %v810_v33, %v1141_v21  ;;  %v942_v21 = vmov 0.0   ;;  %819 = vrsqrt.f32 %v389_v61 }
  0xee   : > { %342 = vxpose.xlu1.b32.cont [6/16] %v326_v2, 128  ;;  %691 = vmatprep.mubr.msk.f32.mxu0 %vm941_vm0, %v942_v21 }
  0xef   : > { %v812_v35 = vpop.eup %811 }
  0xf0   : > { %v333_v17 = vmul.f32 %v812_v35, %v1148_v24  ;;  %v814_v36 = vpop.eup %813  ;;  %v501_v24 = vld [vmem:[%s1262_s2] sm:$0xff] }
  0xf1   : > { %v334_v37 = vmul.f32 %v814_v36, %v1151_v25  ;;  %v503_v25 = vstv %s636_s10 }
  0xf2   : > { %343 = vxpose.xlu1.b32.cont [7/16] %v327_v5, 128  ;;  %v504_v42 = vsub.s32 %v501_v24, %v503_v25 }
  0xf3   : > { %v816_v38 = vpop.eup %815 }
  0xf4   : > { %v335_v20 = vmul.f32 %v816_v38, %v1158_v28  ;;  %v818_v39 = vpop.eup %817  ;;  %506 = vperm.xlu0 %786, %v504_v42  }
  0xf5   : > { %v336_v40 = vmul.f32 %v818_v39, %v1161_v29 }
  0xf6   : > { %344 = vxpose.xlu1.b32.cont [8/16] %v328_v8, 128 }
  0xf7   : > { %v820_v2 = vpop.eup %819 }
  0xf8   : > { %v391_v6 = vmul.f32 %v820_v2, %v1170_v32 }
  0xfa   : > { %345 = vxpose.xlu1.b32.cont [9/16] %v329_v9, 128 }
  0xfe   : > { %346 = vxpose.xlu1.b32.cont [10/16] %v330_v12, 128 }
 0x102   : > { %347 = vxpose.xlu1.b32.cont [11/16] %v331_v13, 128 }
 0x106   : > { %348 = vxpose.xlu1.b32.cont [12/16] %v332_v16, 128 }
 0x10a   : > { %349 = vxpose.xlu1.b32.cont [13/16] %v333_v17, 128 }
 0x10e   : > { %350 = vxpose.xlu1.b32.cont [14/16] %v334_v37, 128 }
 0x112   : > { %351 = vxpose.xlu1.b32.cont [15/16] %v335_v20, 128 }
 0x116   : > { %352 = vxpose.xlu1.b32.end [16/16] %v336_v40, 128 }
 0x15a   : > { %v353_v28 = vpop.trf.xlu1 }
 0x15e   : > { %v354_v43 = vpop.trf.xlu1 }
 0x15f   : > { %v695_v44 = vpack.c.bf16 %v354_v43, %v353_v28 }
 0x161   : > { %696 = vmatpush3.bf16.msra.mxu0 %v695_v44 }
 0x162   : > { %v355_v29 = vpop.trf.xlu1  ;;  %697 = vmatprep.subr.bf16.mxu0 %v940_v56 }
 0x166   : > { %v356_v45 = vpop.trf.xlu1 }
 0x167   : > { %v698_v46 = vpack.c.bf16 %v356_v45, %v355_v29 }
 0x169   : > { %699 = vmatpush3.bf16.msra.mxu0 %v698_v46 }
 0x16a   : > { %v357_v47 = vpop.trf.xlu1  ;;  %700 = vmatprep.subr.bf16.mxu0 %v940_v56 }
 0x16e   : > { %v358_v48 = vpop.trf.xlu1 }
 0x16f   : > { %v701_v49 = vpack.c.bf16 %v358_v48, %v357_v47 }
 0x171   : > { %702 = vmatpush3.bf16.msra.mxu0 %v701_v49 }
 0x172   : > { %v359_v50 = vpop.trf.xlu1  ;;  %703 = vmatprep.subr.bf16.mxu0 %v940_v56 }
 0x173   : > { %v507_v23 = vpop.permute.xlu0 %506 }
 0x174   : > { %vm508_vm3 = vcmp.eq.s32.totalorder %v500_v22, %v507_v23 }
 0x176   : > { %v360_v51 = vpop.trf.xlu1 }
 0x177   : > { %v704_v52 = vpack.c.bf16 %v360_v51, %v359_v50 }
 0x179   : > { %705 = vmatpush3.bf16.msra.mxu0 %v704_v52 }
 0x17a   : > { %v361_v53 = vpop.trf.xlu1  ;;  %706 = vmatprep.subr.bf16.mxu0 %v940_v56 }
 0x17e   : > { %v362_v54 = vpop.trf.xlu1 }
 0x17f   : > { %v707_v55 = vpack.c.bf16 %v362_v54, %v361_v53 }
 0x181   : > { %708 = vmatpush3.bf16.msra.mxu0 %v707_v55 }
 0x182   : > { %v363_v57 = vpop.trf.xlu1  ;;  %709 = vmatprep.subr.bf16.mxu0 %v940_v56 }
 0x186   : > { %v364_v59 = vpop.trf.xlu1 }
 0x187   : > { %v710_v60 = vpack.c.bf16 %v364_v59, %v363_v57 }
 0x189   : > { %711 = vmatpush3.bf16.msra.mxu0 %v710_v60 }
 0x18a   : > { %v365_v62 = vpop.trf.xlu1  ;;  %712 = vmatprep.subr.bf16.mxu0 %v940_v56 }
 0x18e   : > { %v366_v63 = vpop.trf.xlu1 }
 0x18f   : > { %v713_v0 = vpack.c.bf16 %v366_v63, %v365_v62 }
 0x191   : > { %714 = vmatpush3.bf16.msra.mxu0 %v713_v0 }
 0x192   : > { %v367_v1 = vpop.trf.xlu1  ;;  %715 = vmatprep.subr.bf16.mxu0 %v940_v56 }
 0x196   : > { %v368_v3 = vpop.trf.xlu1 }
 0x197   : > { %v716_v4 = vpack.c.bf16 %v368_v3, %v367_v1 }
 0x199   : > { %717 = vmatpush3.bf16.msra.mxu0 %v716_v4 }
 0x19c   : > { %692 = vmatmul.mubr.f32.vlgmr.msra.gmra.mrb[0].mxu0 %v391_v6 }
 0x26f   : > { %v478_v5 = vpop.f32.mrb[0].mxu0 }
 0x270   : > { %v482_v7 = vmul.f32 %v478_v5, %v478_v5  ;;  %v693_v10 = vpop.f32.mrb[1].mxu0  ;;  %v492_v18 = vmul.f32 30.0, %v478_v5  ;;  %vm496_vm4 = vcmp.gt.f32.partialorder %v478_v5, -0.87758255 }
 0x272   : > { %v483_v11 = vsub.f32 1.0, %v482_v7  ;;  %v493_v12 = vmul.f32 0.87758255, %v492_v18  ;;  %v635_v27 = vadd.f32 -7.191383, %v492_v18 }
 0x274   : > { %v484_v8 = vmax.f32 %v483_v11, 0.0 }
 0x276   : > { %821 = vrsqrt.f32 %v484_v8  ;;  %vm487_vm1 = vcmp.eq.f32.partialorder %v484_v8, inf  ;;  %v490_v56 = vand.u32 2147483648, %v484_v8  ;;  %vm489_vm2 = vcmp.eq.f32.partialorder %v484_v8, 0.0 }
 0x280   : > { %v822_v15 = vpop.eup %821 }
 0x281   : > { %v486_v9 = vmul.f32 %v822_v15, %v484_v8 }
 0x283   : > { %v488_v19 = vsel %vm487_vm1, %v484_v8, %v486_v9 }
 0x284   : > { %v491_v32 = vsel %vm489_vm2, %v490_v56, %v488_v19 }
 0x285   : > { %v494_v26 = vmul.f32 14.382766, %v491_v32 }
 0x287   : > { %v495_v30 = vsub.f32 %v493_v12, %v494_v26 }
 0x289   : > { %v498_v13 = vsel %vm496_vm4, %v495_v30, %v635_v27 }
 0x28a   : > { %v509_v31 = vsel %vm508_vm3, %v498_v13, %v492_v18 }
 0x28b   : > { %510 = vst [vmem:[%s215_s23] sm:$0xff] %v509_v31 }
 0x28c   : > { %866 = shalt.err (!%p863_p5)
}
 0x28d   : > { %s867_s11 = scalar_lea.hbm %s1211_s4, 128  ;;  %s871_s6 = scalar_lea.hbm %s1263_s3, 256 }
 0x28e   : > { %p868_p4 = scmp.ne.s32.totalorder %s1211_s4, %s867_s11  ;;  %p872_p12 = scmp.lt.u32.totalorder %s1211_s4, %s1263_s3 }
 0x28f   : > { %p873_p1 = scmp.lt.u32.totalorder %s871_s6, %s867_s11  ;;  %p875_p8 = scmp.lt.u32.totalorder %s867_s11, %s1211_s4 }
 0x290   : > { %p869_p7 = pnand %p868_p4, %p1271_p9 }
 0x291   : > { %p874_p3 = por %p873_p1, %p872_p12 }
 0x292   : > { %p870_p10 = pneg %p869_p7 }
 0x293   : > { %p876_p11 = por %p875_p8, %p874_p3 }
 0x295   : > { %p877_p0 = pnand %p876_p11, %p870_p10 }
 0x297   : > { %880 = shalt.err (!%p877_p0)
}
 0x298   : > { %720 = dma.vmem_to_hbm [thread:$0]  (%p1271_p9), %s1213_s28, 128, %s1211_s4, %s512_s5  }
 0x299 PF: > { %s539_s10 = sand.u32 1, %s915_s12   ;;  %p1272_p6 = scmp.ne.s32.totalorder %s1268_s27, 0 }
 0x29a   : > { %p1273_p13 = scmp.ge.s32.totalorder %s935_s17, 2  ;;  %s540_s22 = scalar_lea.sflag [#allocation6], %s539_s10 }
 0x29c   : > { %p727_p2 = pnand %p1273_p13, %p1272_p6 }
 0x29e   : > { %910 = dma.done.wait (!%p727_p2), %s540_s22, 128  }
 0x29f   : > { %912 = vsyncadd (!%p727_p2), %s540_s22, 4294967168  ;;  %s19_s17 = sadd.s32 1, %s935_s17   ;;  %s1274_s12 = smov %s919_s13 }
 0x2a0   : > { %p16_p5 = scmp.ge.s32.totalorder %s19_s17, 4   ;;  %s1275_s13 = smov %s923_s14 }
 0x2a1   : > { %s1276_s14 = smov %s1021_s26  ;;  %s1277_s15 = smov %s931_s16 }
 0x2a2   : > { %s1278_s16 = smov %s1280_s20  ;;  %18 = sbr.rel (!%p16_p5) target bundleno = 6 (0x6), region = 85 }
 0x2a9   :  { %545 = vsyncpa [#allocation5], 1 }
 0x2aa   :  { %547 = vsyncpa [#allocation5 + $0x1], 1 }
 0x2ab   :  { %548 = vsyncpa [#allocation6], 1 }
 0x2ac   :  { %550 = vsyncpa [#allocation6 + $0x1], 1 }

</bundles_post_ra>
